<compile_context>
chip_gen: v6e
topology: v6e:2x2x1
jax: 0.10.0
libtpu: 0.0.40
codegen_flags: <defaults>
</compile_context>

<pallas_src>
import jax
import jax.numpy as jnp
from jax import lax
from jax.experimental import pallas as pl
from jax.experimental.pallas import tpu as pltpu

# ---- problem sizes (small, synthetic; module itself is size-agnostic) ----
DIN = 32       # input embedding dimension
H1 = 64        # encoder hidden width
HID = 32       # hidden_dimension (encoder output)
K = 10         # cluster_number
ALPHA = 1.0    # t-distribution degrees of freedom

KPAD = 16      # cluster dim padded 10 -> 16 (sublane multiple; output sublane dim)
PAD_CC = 1e30  # large finite ||mu||^2 for padded clusters (NOT +inf -> NR would NaN)
TB_MAX = 1024  # cap on rows per grid step (double-buffered footprint ~ a few MiB,
               # far under v7x's 64 MiB VMEM / 32 MiB scoped default)


def _recip(x):
    """Reciprocal via EUP approx vrcp + one Newton-Raphson step (~f32 accurate).

    Do NOT drop the NR refinement: it is what keeps the two chained reciprocals
    (numerator + normalization) inside the 1e-5 tolerance."""
    r = pl.reciprocal(x, approx=True)
    return r * (2.0 - x * r)


def dec_kernel(x_ref, w1_ref, b1_ref, w2_ref, b2_ref, c_ref, cc_ref, q_ref):
    # ---- encoder: Linear -> ReLU -> Linear (two MXU matmuls, f32 accumulate) ----
    x = x_ref[...]                                                    # [TB, DIN]
    h1 = jnp.dot(x, w1_ref[...], preferred_element_type=jnp.float32) + b1_ref[...]
    h1 = jnp.maximum(h1, 0.0)
    z = jnp.dot(h1, w2_ref[...], preferred_element_type=jnp.float32) + b2_ref[...]  # [TB, HID]

    # ---- ClusterAssignment (computed transposed: clusters on sublanes) ----
    # ||z_i - mu_j||^2 = ||mu_j||^2 + ||z_i||^2 - 2 <mu_j, z_i>
    # NOTE: expanded-square form can cancel for very large-magnitude embeddings;
    # within the synthetic magnitudes here it stays well inside 1e-5.
    c = c_ref[...]                                    # [KPAD, HID] (zero-padded rows)
    cc = cc_ref[...]                                  # [KPAD, 1]   (padded rows = 1e30)
    zz = jnp.sum(z * z, axis=-1)[None, :]             # [1, TB]  (small XLU relayout)
    # contract last dims directly -> [KPAD, TB], no transpose of the big operand
    cross = lax.dot_general(c, z, (((1,), (1,)), ((), ())),
                            preferred_element_type=jnp.float32)      # [KPAD, TB]
    dist = jnp.maximum(cc + zz - 2.0 * cross, 0.0)    # padded clusters -> ~1e30

    if ALPHA == 1.0:
        # exponent is exactly -1 -> single reciprocal instead of pow (log+exp)
        numerator = _recip(1.0 + dist)                # padded clusters -> ~1e-30
    else:
        power = -(ALPHA + 1.0) / 2.0
        numerator = jnp.exp(power * jnp.log1p(dist / ALPHA))

    denom = jnp.sum(numerator, axis=0, keepdims=True)                # [1, TB]
    q_ref[...] = numerator * _recip(denom)            # lane-dense [KPAD, TB] store


def _round_up(v, m):
    return ((v + m - 1) // m) * m


def _pick_tb(b):
    """Largest 128-aligned batch tile <= TB_MAX that still leaves >= 2 grid steps
    (so v7x's two TensorCores both get work via the 'parallel' grid axis)."""
    half = -(-b // 2)                       # ceil(b / 2)
    return max(128, min(TB_MAX, _round_up(half, 128)))


def dec_forward(x, w1, b1, w2, b2, centers):
    """Full DEC forward pass: batched grid over rows, narrow transposed q output."""
    b, din = x.shape
    k, hid = centers.shape

    tb = _pick_tb(b)
    n_tiles = -(-b // tb)
    b_pad = n_tiles * tb
    if b_pad != b:                          # pad rows to a whole number of tiles
        x = jnp.pad(x, ((0, b_pad - b), (0, 0)))

    # pad cluster dim to KPAD; precompute ||mu||^2 with large-finite padding so the
    # padded clusters vanish from the normalization without any in-kernel mask
    centers_p = jnp.pad(centers, ((0, KPAD - k), (0, 0)))
    cc = jnp.sum(centers * centers, axis=-1)                              # [K]
    cc_p = jnp.concatenate(
        [cc, jnp.full((KPAD - k,), PAD_CC, dtype=jnp.float32)])[:, None]  # [KPAD, 1]

    q_pad = pl.pallas_call(
        dec_kernel,
        out_shape=jax.ShapeDtypeStruct((KPAD, b_pad), jnp.float32),
        grid=(n_tiles,),
        in_specs=[
            pl.BlockSpec((tb, din), lambda i: (i, 0)),        # batch tile
            pl.BlockSpec(w1.shape, lambda i: (0, 0)),         # grid-invariant weights
            pl.BlockSpec(b1.shape, lambda i: (0, 0)),
            pl.BlockSpec(w2.shape, lambda i: (0, 0)),
            pl.BlockSpec(b2.shape, lambda i: (0, 0)),
            pl.BlockSpec(centers_p.shape, lambda i: (0, 0)),
            pl.BlockSpec(cc_p.shape, lambda i: (0, 0)),
        ],
        out_specs=pl.BlockSpec((KPAD, tb), lambda i: (0, i)),  # transposed, lane-dense
        compiler_params=pltpu.CompilerParams(
            dimension_semantics=("parallel",)),                # v7x: shard over both TCs
    )(x, w1, b1, w2, b2, centers_p, cc_p)

    return q_pad[:k, :b].T                                     # [B, K]


def dec_forward_ref(x, w1, b1, w2, b2, centers):
    """Pure-JAX reference mirroring the PyTorch semantics."""
    h1 = jnp.maximum(x @ w1 + b1, 0.0)
    z = h1 @ w2 + b2
    diff = z[:, None, :] - centers[None, :, :]          # [B, K, Hid]
    dist = jnp.sum(diff * diff, axis=2)                 # [B, K]
    num = (1.0 + dist / ALPHA) ** (-(ALPHA + 1.0) / 2.0)
    return num / jnp.sum(num, axis=1, keepdims=True)


if __name__ == "__main__":
    key = jax.random.PRNGKey(0)
    kx, k1, k2, k3, k4, k5 = jax.random.split(key, 6)

    B = 256  # demo batch (2 grid steps); wrapper handles any B via padding
    x = jax.random.normal(kx, (B, DIN), dtype=jnp.float32)
    w1 = jax.random.normal(k1, (DIN, H1), dtype=jnp.float32) * 0.1
    b1 = jax.random.normal(k2, (1, H1), dtype=jnp.float32) * 0.01
    w2 = jax.random.normal(k3, (H1, HID), dtype=jnp.float32) * 0.1
    b2 = jax.random.normal(k4, (1, HID), dtype=jnp.float32) * 0.01
    centers = jax.random.normal(k5, (K, HID), dtype=jnp.float32)  # cluster_centers

    q = dec_forward(x, w1, b1, w2, b2, centers)
    q = jax.block_until_ready(q)

    q_ref = dec_forward_ref(x, w1, b1, w2, b2, centers)
    assert q.shape == (B, K)
    assert jnp.allclose(q, q_ref, atol=1e-5, rtol=1e-5)
    assert jnp.allclose(jnp.sum(q, axis=1), jnp.ones((B,)), atol=1e-5)

    # also exercise the ragged-batch padding path (B not a multiple of the tile)
    q_small = jax.block_until_ready(dec_forward(x[:40], w1, b1, w2, b2, centers))
    q_small_ref = dec_forward_ref(x[:40], w1, b1, w2, b2, centers)
    assert q_small.shape == (40, K)
    assert jnp.allclose(q_small, q_small_ref, atol=1e-5, rtol=1e-5)

    print("KERNEL_OK")
</pallas_src>

<mosaic_0001>
module attributes {stable_mosaic.version = 11 : i64} {
  func.func @dec_kernel(%arg0: i32, %arg1: memref<128x32xf32, #tpu.memory_space<vmem>>, %arg2: memref<32x64xf32, #tpu.memory_space<vmem>>, %arg3: memref<1x64xf32, #tpu.memory_space<vmem>>, %arg4: memref<64x32xf32, #tpu.memory_space<vmem>>, %arg5: memref<1x32xf32, #tpu.memory_space<vmem>>, %arg6: memref<16x32xf32, #tpu.memory_space<vmem>>, %arg7: memref<16x1xf32, #tpu.memory_space<vmem>>, %arg8: memref<16x128xf32, #tpu.memory_space<vmem>>) attributes {dimension_semantics = [#tpu.dimension_semantics<parallel>], iteration_bounds = array<i64: 2>, scalar_prefetch = 0 : i64, scratch_operands = 0 : i64, tpu.core_type = #tpu.core_type<tc>, window_params = [{transform_indices = @transform_0, window_bounds = array<i64: 128, 32>}, {pipeline_mode = #tpu.pipeline_mode<synchronous>, transform_indices = @transform_1, window_bounds = array<i64: 32, 64>}, {pipeline_mode = #tpu.pipeline_mode<synchronous>, transform_indices = @transform_2, window_bounds = array<i64: 1, 64>}, {pipeline_mode = #tpu.pipeline_mode<synchronous>, transform_indices = @transform_3, window_bounds = array<i64: 64, 32>}, {pipeline_mode = #tpu.pipeline_mode<synchronous>, transform_indices = @transform_4, window_bounds = array<i64: 1, 32>}, {pipeline_mode = #tpu.pipeline_mode<synchronous>, transform_indices = @transform_5, window_bounds = array<i64: 16, 32>}, {pipeline_mode = #tpu.pipeline_mode<synchronous>, transform_indices = @transform_6, window_bounds = array<i64: 16, 1>}, {transform_indices = @transform_7, window_bounds = array<i64: 16, 128>}]} {
    %c0 = arith.constant 0 : index
    %c0_0 = arith.constant 0 : index
    %0 = vector.load %arg1[%c0, %c0_0] : memref<128x32xf32, #tpu.memory_space<vmem>>, vector<128x32xf32>
    %c0_1 = arith.constant 0 : index
    %c0_2 = arith.constant 0 : index
    %1 = vector.load %arg2[%c0_1, %c0_2] : memref<32x64xf32, #tpu.memory_space<vmem>>, vector<32x64xf32>
    %cst = arith.constant dense<0.000000e+00> : vector<128x64xf32>
    %2 = tpu.matmul %0, %1, %cst {dimension_numbers = #tpu.dot_dimension_numbers<[1], [0], [0], [1], [0, 0, 1, 1], [], []>} : vector<128x32xf32>, vector<32x64xf32>, vector<128x64xf32> -> vector<128x64xf32>
    %c0_3 = arith.constant 0 : index
    %c0_4 = arith.constant 0 : index
    %3 = vector.load %arg3[%c0_3, %c0_4] : memref<1x64xf32, #tpu.memory_space<vmem>>, vector<1x64xf32>
    %4 = vector.broadcast %3 : vector<1x64xf32> to vector<128x64xf32>
    %5 = arith.addf %2, %4 : vector<128x64xf32>
    %cst_5 = arith.constant 0.000000e+00 : f32
    %6 = vector.broadcast %cst_5 : f32 to vector<128x64xf32>
    %7 = arith.maximumf %5, %6 : vector<128x64xf32>
    %c0_6 = arith.constant 0 : index
    %c0_7 = arith.constant 0 : index
    %8 = vector.load %arg4[%c0_6, %c0_7] : memref<64x32xf32, #tpu.memory_space<vmem>>, vector<64x32xf32>
    %cst_8 = arith.constant dense<0.000000e+00> : vector<128x32xf32>
    %9 = tpu.matmul %7, %8, %cst_8 {dimension_numbers = #tpu.dot_dimension_numbers<[1], [0], [0], [1], [0, 0, 1, 1], [], []>} : vector<128x64xf32>, vector<64x32xf32>, vector<128x32xf32> -> vector<128x32xf32>
    %c0_9 = arith.constant 0 : index
    %c0_10 = arith.constant 0 : index
    %10 = vector.load %arg5[%c0_9, %c0_10] : memref<1x32xf32, #tpu.memory_space<vmem>>, vector<1x32xf32>
    %11 = vector.broadcast %10 : vector<1x32xf32> to vector<128x32xf32>
    %12 = arith.addf %9, %11 : vector<128x32xf32>
    %c0_11 = arith.constant 0 : index
    %c0_12 = arith.constant 0 : index
    %13 = vector.load %arg6[%c0_11, %c0_12] : memref<16x32xf32, #tpu.memory_space<vmem>>, vector<16x32xf32>
    %c0_13 = arith.constant 0 : index
    %c0_14 = arith.constant 0 : index
    %14 = vector.load %arg7[%c0_13, %c0_14] : memref<16x1xf32, #tpu.memory_space<vmem>>, vector<16x1xf32>
    %15 = arith.mulf %12, %12 : vector<128x32xf32>
    %cst_15 = arith.constant dense<0.000000e+00> : vector<128xf32>
    %16 = vector.multi_reduction <add>, %15, %cst_15 [1] : vector<128x32xf32> to vector<128xf32>
    %17 = vector.shape_cast %16 : vector<128xf32> to vector<1x128xf32>
    %cst_16 = arith.constant dense<0.000000e+00> : vector<16x128xf32>
    %18 = tpu.matmul %13, %12, %cst_16 {dimension_numbers = #tpu.dot_dimension_numbers<[1], [1], [0], [0], [0, 0, 1, 0], [], []>} : vector<16x32xf32>, vector<128x32xf32>, vector<16x128xf32> -> vector<16x128xf32>
    %19 = vector.broadcast %14 : vector<16x1xf32> to vector<16x128xf32>
    %20 = vector.broadcast %17 : vector<1x128xf32> to vector<16x128xf32>
    %21 = arith.addf %19, %20 : vector<16x128xf32>
    %cst_17 = arith.constant 2.000000e+00 : f32
    %22 = vector.broadcast %cst_17 : f32 to vector<16x128xf32>
    %23 = arith.mulf %22, %18 : vector<16x128xf32>
    %24 = arith.subf %21, %23 : vector<16x128xf32>
    %cst_18 = arith.constant 0.000000e+00 : f32
    %25 = vector.broadcast %cst_18 : f32 to vector<16x128xf32>
    %26 = arith.maximumf %24, %25 : vector<16x128xf32>
    %cst_19 = arith.constant 1.000000e+00 : f32
    %27 = vector.broadcast %cst_19 : f32 to vector<16x128xf32>
    %28 = arith.addf %27, %26 : vector<16x128xf32>
    %29 = tpu.reciprocal %28 {approx = true} : vector<16x128xf32> -> vector<16x128xf32>
    %30 = arith.mulf %28, %29 : vector<16x128xf32>
    %cst_20 = arith.constant 2.000000e+00 : f32
    %31 = vector.broadcast %cst_20 : f32 to vector<16x128xf32>
    %32 = arith.subf %31, %30 : vector<16x128xf32>
    %33 = arith.mulf %29, %32 : vector<16x128xf32>
    %cst_21 = arith.constant dense<0.000000e+00> : vector<128xf32>
    %34 = vector.multi_reduction <add>, %33, %cst_21 [0] : vector<16x128xf32> to vector<128xf32>
    %35 = vector.shape_cast %34 : vector<128xf32> to vector<1x128xf32>
    %36 = tpu.reciprocal %35 {approx = true} : vector<1x128xf32> -> vector<1x128xf32>
    %37 = arith.mulf %35, %36 : vector<1x128xf32>
    %cst_22 = arith.constant 2.000000e+00 : f32
    %38 = vector.broadcast %cst_22 : f32 to vector<1x128xf32>
    %39 = arith.subf %38, %37 : vector<1x128xf32>
    %40 = arith.mulf %36, %39 : vector<1x128xf32>
    %41 = vector.broadcast %40 : vector<1x128xf32> to vector<16x128xf32>
    %42 = arith.mulf %33, %41 : vector<16x128xf32>
    %c0_23 = arith.constant 0 : index
    %c0_24 = arith.constant 0 : index
    %43 = vector.load %arg8[%c0_23, %c0_24] : memref<16x128xf32, #tpu.memory_space<vmem>>, vector<16x128xf32>
    tpu.vector_store %arg8[%c0_23, %c0_24], %42 {strides = array<i32>} : memref<16x128xf32, #tpu.memory_space<vmem>>, vector<16x128xf32>,
    return
  }
  func.func @transform_0(%arg0: i32) -> (i32, i32) {
    %c0_i32 = arith.constant 0 : i32
    %c0_i32_0 = arith.constant 0 : i32
    return %arg0, %c0_i32 : i32, i32
  }
  func.func @transform_1(%arg0: i32) -> (i32, i32) {
    %c0_i32 = arith.constant 0 : i32
    %c0_i32_0 = arith.constant 0 : i32
    %c0_i32_1 = arith.constant 0 : i32
    return %c0_i32, %c0_i32_0 : i32, i32
  }
  func.func @transform_2(%arg0: i32) -> (i32, i32) {
    %c0_i32 = arith.constant 0 : i32
    %c0_i32_0 = arith.constant 0 : i32
    %c0_i32_1 = arith.constant 0 : i32
    return %c0_i32, %c0_i32_0 : i32, i32
  }
  func.func @transform_3(%arg0: i32) -> (i32, i32) {
    %c0_i32 = arith.constant 0 : i32
    %c0_i32_0 = arith.constant 0 : i32
    %c0_i32_1 = arith.constant 0 : i32
    return %c0_i32, %c0_i32_0 : i32, i32
  }
  func.func @transform_4(%arg0: i32) -> (i32, i32) {
    %c0_i32 = arith.constant 0 : i32
    %c0_i32_0 = arith.constant 0 : i32
    %c0_i32_1 = arith.constant 0 : i32
    return %c0_i32, %c0_i32_0 : i32, i32
  }
  func.func @transform_5(%arg0: i32) -> (i32, i32) {
    %c0_i32 = arith.constant 0 : i32
    %c0_i32_0 = arith.constant 0 : i32
    %c0_i32_1 = arith.constant 0 : i32
    return %c0_i32, %c0_i32_0 : i32, i32
  }
  func.func @transform_6(%arg0: i32) -> (i32, i32) {
    %c0_i32 = arith.constant 0 : i32
    %c0_i32_0 = arith.constant 0 : i32
    %c0_i32_1 = arith.constant 0 : i32
    return %c0_i32, %c0_i32_0 : i32, i32
  }
  func.func @transform_7(%arg0: i32) -> (i32, i32) {
    %c0_i32 = arith.constant 0 : i32
    %c0_i32_0 = arith.constant 0 : i32
    return %c0_i32, %arg0 : i32, i32
  }
}

</mosaic_0001>

<bundles_post_ra>
// kernel: tpu_custom_call.1
= control target key start
LH: loop header
LB: loop body
LE: loop exit
PB: predicated region body
PF: predicated region fallthrough
CT: control target
= control target key end

     0   :  { %12 = vsyncpa [#allocation3], 0  ;;  %s1933_s0 = inlined_call_operand.vmem [shape: f32[256,32], index: 0, kind: input, shape index: {}]   ;;  %s1934_s1 = inlined_call_operand.vmem [shape: f32[32,64], index: 1, kind: input, shape index: {}]   ;;  %s1935_s2 = inlined_call_operand.vmem [shape: f32[1,64], index: 2, kind: input, shape index: {}]   ;;  %s1936_s3 = inlined_call_operand.vmem [shape: f32[64,32], index: 3, kind: input, shape index: {}]   ;;  %s1937_s4 = inlined_call_operand.vmem [shape: f32[1,32], index: 4, kind: input, shape index: {}]   ;;  %s1938_s5 = inlined_call_operand.vmem [shape: f32[16,32], index: 5, kind: input, shape index: {}]   ;;  %s1939_s6 = inlined_call_operand.vmem [shape: f32[16,1], index: 6, kind: input, shape index: {}]   ;;  %s1940_s7 = inlined_call_operand.hbm [shape: f32[16,256], index: 7, kind: output, shape index: {}]  }
   0x1   :  { %14 = vsyncpa [#allocation3 + $0x1], 0  ;;  %s1570_s24 = smov 0   ;;  %s1572_s25 = smov 0  }
   0x2   :  { %s1574_s26 = smov 0   ;;  %s1576_s27 = smov 0  }
   0x3 LB: > { %s1591_s28 = sadd.s32 4294967295, %s1523_s27   ;;  %s1180_s29 = sadd.s32 4294967294, %s1523_s27   ;;  %s1523_s27 = sphi %s1576_s27, %s1946_s27   ;;  %s1519_s26 = sphi %s1574_s26, %s1945_s26   ;;  %s1515_s25 = sphi %s1572_s25, %s1944_s25   ;;  %s1511_s24 = sphi %s1570_s24, %s1943_s24  }
   0x4   : > { %s1595_s30 = sadd.s32 1, %s1523_s27   ;;  %s179_s8 = sadd.s32 1, %s1519_s26 }
   0x5   : > { %s176_s9 = ssub.s32 %s1523_s27, %s1595_s30  ;;  %p189_p0 = scmp.ne.s32.totalorder %s1519_s26, %s1515_s25 }
   0x6   : > { %p177_p1 = scmp.eq.s32.totalorder %s176_s9, 0  ;;  %p190_p2 = scmp.eq.s32.totalorder %s1591_s28, 1 }
   0x7   : > { %p195_p3 = scmp.ne.s32.totalorder %s1515_s25, %s1511_s24  ;;  %p196_p4 = scmp.eq.s32.totalorder %s1180_s29, 1 }
   0x8   : > { %s1606_s10 = scalar_select %p177_p1, %s1519_s26, %s179_s8  }
   0x9   : > { %p1608_p5 = por %p190_p2, %p189_p0  ;;  %p1612_p6 = por %p196_p4, %p195_p3 }
   0xa   : > { %p1183_p7 = scmp.ge.s32.totalorder %s1523_s27, 1  ;;  %p241_p8 = scmp.lt.s32.totalorder %s1523_s27, 3 }
   0xc   : > { %p242_p9 = pnand %p1183_p7, %p241_p8 }
   0xd   : > { %s1185_s17 = sshll.u32 (!%p242_p9), %s1591_s28, 4  ;;  %s270_s13 = sand.u32 (!%p242_p9), 1, %s1515_s25  }
   0xe   : > { %245 = sbr.rel (%p242_p9) target bundleno = 789 (0x315), region = 48  ;;  %p274_p10 = scmp.lt.s32.totalorder (!%p242_p9), %s1185_s17, 31 }
   0xf   : > { %s1184_s14 = sshll.u32 (!%p242_p9), %s270_s13, 4  ;;  %s1240_s15 = sshll.u32 (!%p242_p9), %s1591_s28, 7 }
  0x10   : > { %s272_s16 = scalar_lea.vmem (!%p242_p9), [#allocation2], %s1184_s14  ;;  %s1889_s19 = scalar_lea.hbm (!%p242_p9), %s1940_s7, %s1240_s15 }
  0x11   : > { %s1893_s20 = scalar_lea.sflag (!%p242_p9), [#allocation3], %s270_s13  ;;  %s1526_s21 = smov (!%p242_p9), [#allocation2]  }
  0x13   : > { %v298_v0 = vld [vmem:[%s1934_s1 + $0x18] sm:$0xff]  ;;  %v297_v1 = vld [vmem:[%s1934_s1 + $0x10] sm:$0xff]  ;;  %v296_v2 = vld [vmem:[%s1934_s1 + $0x8] sm:$0xff]  ;;  %s1948_s17 = smov (!%p274_p10, %s1185_s17), 31  ;;  %vm306_vm0 = vcmask 261120   ;;  %vm531_vm1 = vcmask 523264  }
  0x14   : > { %1305 = vmatprep.subr.mxu1 %v298_v0  ;;  %v295_v3 = vld [vmem:[%s1934_s1] sm:$0xff]  ;;  %s1186_s22 = sshll.u32 %s1948_s17, 3  ;;  %v523_v4 = vld [vmem:[%s1936_s3 + $0x38] sm:$0xff]  ;;  %v522_v8 = vld [vmem:[%s1936_s3 + $0x30] sm:$0xff]  ;;  %vm959_vm2 = vcmask 130112   ;;  %vm966_vm3 = vcmask 195712  }
  0x15   : > { %1306 = vmatpush3.msra.mxu1 %v298_v0  ;;  %s1634_s8 = scalar_lea.vmem %s1933_s0, %s1186_s22  ;;  %v521_v10 = vld [vmem:[%s1936_s3 + $0x28] sm:$0xff]  ;;  %v520_v12 = vld [vmem:[%s1936_s3 + $0x20] sm:$0xff]  ;;  %v519_v14 = vld [vmem:[%s1936_s3 + $0x18] sm:$0xff]  ;;  %vm973_vm4 = vcmask 261312   ;;  %vm980_vm5 = vcmask 326912   ;;  %vm987_vm6 = vcmask 392512  }
  0x16   : > { %1307 = vmatprep.subr.mxu1 %v297_v1  ;;  %v279_v5 = vld [vmem:[%s1634_s8] sm:$0xff]  ;;  %v280_v6 = vld [vmem:[%s1634_s8 + $0x8] sm:$0xff]  ;;  %v281_v7 = vld [vmem:[%s1634_s8 + $0x10] sm:$0xff]  ;;  %vm994_vm7 = vcmask 458112   ;;  %vm1001_vm8 = vcmask 523712   ;;  %vm1008_vm9 = vcmask 589312  }
  0x17   : > { %1308 = vmatpush3.msra.mxu1 %v297_v1  ;;  %1313 = vmatprep.mubr.msk.f32.mxu1 %vm306_vm0, %v279_v5  ;;  %v282_v9 = vld [vmem:[%s1634_s8 + $0x18] sm:$0xff]  ;;  %v283_v11 = vld [vmem:[%s1634_s8 + $0x20] sm:$0xff]  ;;  %v284_v13 = vld [vmem:[%s1634_s8 + $0x28] sm:$0xff]  ;;  %vm1015_vm10 = vcmask 654912   ;;  %vm1022_vm11 = vcmask 720512   ;;  %vm1029_vm12 = vcmask 786112  }
  0x18   : > { %1309 = vmatprep.subr.mxu1 %v296_v2  ;;  %v285_v15 = vld [vmem:[%s1634_s8 + $0x30] sm:$0xff]  ;;  %v286_v17 = vld [vmem:[%s1634_s8 + $0x38] sm:$0xff]  ;;  %v517_v18 = vld [vmem:[%s1936_s3 + $0x8] sm:$0xff]  ;;  %vm1036_vm13 = vcmask 851712   ;;  %vm1043_vm14 = vcmask 917312   ;;  %vm1050_vm15 = vcmask 982912  }
  0x19   : > { %1310 = vmatpush3.msra.mxu1 %v296_v2  ;;  %v518_v16 = vld [vmem:[%s1936_s3 + $0x10] sm:$0xff]  ;;  %v287_v19 = vld [vmem:[%s1634_s8 + $0x40] sm:$0xff]  ;;  %v288_v20 = vld [vmem:[%s1634_s8 + $0x48] sm:$0xff]  ;;  %s1467_s22 = sshll.u32 %s1526_s21, 4  ;;  %s1468_s22 = int_to_ptr.vmem [resolvable:$false] %s1467_s22 }
  0x1a   : > { %1311 = vmatprep.subr.mxu1 %v295_v3  ;;  %v289_v21 = vld [vmem:[%s1634_s8 + $0x50] sm:$0xff]  ;;  %v290_v22 = vld [vmem:[%s1634_s8 + $0x58] sm:$0xff]  ;;  %v291_v23 = vld [vmem:[%s1634_s8 + $0x60] sm:$0xff]  ;;  %s1469_s23 = scalar_lea.vmem %s1468_s22, 512 }
  0x1b   : > { %1312 = vmatpush3.msra.mxu1 %v295_v3  ;;  %v292_v24 = vld [vmem:[%s1634_s8 + $0x68] sm:$0xff]  ;;  %v293_v25 = vld [vmem:[%s1634_s8 + $0x70] sm:$0xff]  ;;  %v294_v26 = vld [vmem:[%s1634_s8 + $0x78] sm:$0xff]  ;;  %s1118_s8 = sshll.u32 %s272_s16, 4  ;;  %s1891_s8 = int_to_ptr.vmem [resolvable:$true] %s1118_s8 }
  0x1c   : > { %1314 = vmatmul.mubr.msk.f32.vlgmr.msra.gmra.mxu1 %vm306_vm0, %v280_v6  ;;  %1337 = vmatprep.subr.mxu1 %v523_v4  ;;  %v516_v27 = vld [vmem:[%s1936_s3] sm:$0xff]  ;;  %s1463_s28 = scalar_lea.vmem %s1891_s8, 256  ;;  %p1470_p0 = scmp.lt.s32.totalorder %s1891_s8, %s1468_s22 }
  0x1d   : > { %1316 = vmatprep.mubr.msk.f32.mxu1 %vm306_vm0, %v281_v7  ;;  %1338 = vmatpush3.msra.mxu1 %v523_v4  ;;  %v1187_v28 = vld [vmem:[%s1935_s2] ss:$0 sm:$0xff]  ;;  %p1464_p11 = scmp.ne.s32.totalorder %s1891_s8, %s1463_s28  ;;  %p1471_p1 = scmp.lt.s32.totalorder %s1469_s23, %s1463_s28 }
  0x1e   : > { %1339 = vmatprep.subr.mxu1 %v522_v8 }
  0x1f   : > { %1340 = vmatpush3.msra.mxu1 %v522_v8  ;;  %p1465_p12 = pnand %p1464_p11, %p1608_p5  ;;  %p1472_p2 = por %p1471_p1, %p1470_p0 }
  0x20   : > { %1317 = vmatmul.mubr.msk.f32.gmra.mxu1 %vm306_vm0, %v282_v9  ;;  %1341 = vmatprep.subr.mxu1 %v521_v10 }
  0x21   : > { %1319 = vmatprep.mubr.msk.f32.mxu1 %vm306_vm0, %v283_v11  ;;  %1342 = vmatpush3.msra.mxu1 %v521_v10  ;;  %p1466_p13 = pneg %p1465_p12 }
  0x22   : > { %1343 = vmatprep.subr.mxu1 %v520_v12 }
  0x23   : > { %1344 = vmatpush3.msra.mxu1 %v520_v12  ;;  %p1473_p3 = pnand %p1472_p2, %p1466_p13 }
  0x24   : > { %1320 = vmatmul.mubr.msk.f32.gmra.mxu1 %vm306_vm0, %v284_v13  ;;  %1345 = vmatprep.subr.mxu1 %v519_v14  ;;  %v1525_v13 = vmov 0  }
  0x25   : > { %1322 = vmatprep.mubr.msk.f32.mxu1 %vm306_vm0, %v285_v15  ;;  %1346 = vmatpush3.msra.mxu1 %v519_v14  ;;  %v725_v14 = vld [vmem:[%s1938_s5] sm:$0xff] }
  0x26   : > { %1347 = vmatprep.subr.mxu1 %v518_v16  ;;  %1456 = vset.pattern.permute.xlu1 %v1525_v13  ;;  %v1718_v15 = vld [vmem:[%s1937_s4] ss:$0 sm:$0xff] }
  0x27   : > { %1348 = vmatpush3.msra.mxu1 %v518_v16  ;;  %1455 = vset.pattern.permute.xlu0 %v1525_v13 }
  0x28   : > { %1323 = vmatmul.mubr.msk.f32.gmra.mxu1 %vm306_vm0, %v286_v17  ;;  %1349 = vmatprep.subr.mxu1 %v517_v18 }
  0x29   : > { %1325 = vmatprep.mubr.msk.f32.mxu1 %vm306_vm0, %v287_v19  ;;  %1350 = vmatpush3.msra.mxu1 %v517_v18 }
  0x2a   : > { %1351 = vmatprep.subr.mxu1 %v516_v27  ;;  %1409 = vmatprep.mubr.msk.f32.mxu0 %vm306_vm0, %v725_v14 }
  0x2b   : > { %1352 = vmatpush3.msra.mxu1 %v516_v27 }
  0x2c   : > { %1326 = vmatmul.mubr.msk.f32.gmra.mxu1 %vm306_vm0, %v288_v20 }
  0x2d   : > { %1328 = vmatprep.mubr.msk.f32.mxu1 %vm306_vm0, %v289_v21 }
  0x30   : > { %1329 = vmatmul.mubr.msk.f32.gmra.mxu1 %vm306_vm0, %v290_v22 }
  0x31   : > { %1331 = vmatprep.mubr.msk.f32.mxu1 %vm306_vm0, %v291_v23 }
  0x34   : > { %1332 = vmatmul.mubr.msk.f32.gmra.mxu1 %vm306_vm0, %v292_v24 }
  0x35   : > { %1334 = vmatprep.mubr.msk.f32.mxu1 %vm306_vm0, %v293_v25 }
  0x38   : > { %1335 = vmatmul.mubr.msk.f32.gmra.mxu1 %vm306_vm0, %v294_v26 }
  0xdc   : > { %v1315_v29 = vpop.f32.mrf.mxu1 }
  0xdd   : > { %v427_v30 = vadd.f32 %v1315_v29, %v1187_v28 }
  0xde   : > { %v421_v31 = vpop.f32.mrf.mxu1 }
  0xdf   : > { %v422_v32 = vadd.f32 %v1187_v28, %v421_v31  ;;  %v501_v35 = vmax.f32 %v427_v30, 0.0 }
  0xe0   : > { %v1318_v33 = vpop.f32.mrf.mxu1 }
  0xe1   : > { %v500_v34 = vmax.f32 %v422_v32, 0.0  ;;  %v437_v36 = vadd.f32 %v1318_v33, %v1187_v28 }
  0xe2   : > { %v431_v37 = vpop.f32.mrf.mxu1 }
  0xe3   : > { %v432_v38 = vadd.f32 %v1187_v28, %v431_v37  ;;  %1353 = vmatprep.mubr.msk.f32.mxu1 %vm531_vm1, %v500_v34  ;;  %v503_v41 = vmax.f32 %v437_v36, 0.0 }
  0xe4   : > { %v1321_v39 = vpop.f32.mrf.mxu1  ;;  %1354 = vmatmul.mubr.msk.f32.vlgmr.msra.gmra.mxu1 %vm531_vm1, %v501_v35 }
  0xe5   : > { %v502_v40 = vmax.f32 %v432_v38, 0.0  ;;  %v447_v42 = vadd.f32 %v1321_v39, %v1187_v28 }
  0xe6   : > { %v441_v43 = vpop.f32.mrf.mxu1 }
  0xe7   : > { %v442_v44 = vadd.f32 %v1187_v28, %v441_v43  ;;  %1356 = vmatprep.mubr.msk.f32.mxu1 %vm531_vm1, %v502_v40  ;;  %v505_v47 = vmax.f32 %v447_v42, 0.0 }
  0xe8   : > { %v1324_v45 = vpop.f32.mrf.mxu1  ;;  %1357 = vmatmul.mubr.msk.f32.gmra.mxu1 %vm531_vm1, %v503_v41 }
  0xe9   : > { %v504_v46 = vmax.f32 %v442_v44, 0.0  ;;  %v457_v48 = vadd.f32 %v1324_v45, %v1187_v28 }
  0xea   : > { %v451_v49 = vpop.f32.mrf.mxu1 }
  0xeb   : > { %v452_v50 = vadd.f32 %v1187_v28, %v451_v49  ;;  %1359 = vmatprep.mubr.msk.f32.mxu1 %vm531_vm1, %v504_v46  ;;  %v507_v53 = vmax.f32 %v457_v48, 0.0 }
  0xec   : > { %v1327_v51 = vpop.f32.mrf.mxu1  ;;  %1360 = vmatmul.mubr.msk.f32.gmra.mxu1 %vm531_vm1, %v505_v47 }
  0xed   : > { %v506_v52 = vmax.f32 %v452_v50, 0.0  ;;  %v467_v54 = vadd.f32 %v1327_v51, %v1187_v28 }
  0xee   : > { %v461_v55 = vpop.f32.mrf.mxu1 }
  0xef   : > { %v462_v56 = vadd.f32 %v1187_v28, %v461_v55  ;;  %1362 = vmatprep.mubr.msk.f32.mxu1 %vm531_vm1, %v506_v52  ;;  %v509_v59 = vmax.f32 %v467_v54, 0.0 }
  0xf0   : > { %v1330_v57 = vpop.f32.mrf.mxu1  ;;  %1363 = vmatmul.mubr.msk.f32.gmra.mxu1 %vm531_vm1, %v507_v53 }
  0xf1   : > { %v508_v58 = vmax.f32 %v462_v56, 0.0  ;;  %v477_v60 = vadd.f32 %v1330_v57, %v1187_v28 }
  0xf2   : > { %v471_v61 = vpop.f32.mrf.mxu1 }
  0xf3   : > { %v472_v62 = vadd.f32 %v1187_v28, %v471_v61  ;;  %1365 = vmatprep.mubr.msk.f32.mxu1 %vm531_vm1, %v508_v58  ;;  %v511_v1 = vmax.f32 %v477_v60, 0.0 }
  0xf4   : > { %v1333_v63 = vpop.f32.mrf.mxu1  ;;  %1366 = vmatmul.mubr.msk.f32.gmra.mxu1 %vm531_vm1, %v509_v59 }
  0xf5   : > { %v510_v0 = vmax.f32 %v472_v62, 0.0  ;;  %v487_v2 = vadd.f32 %v1333_v63, %v1187_v28 }
  0xf6   : > { %v481_v3 = vpop.f32.mrf.mxu1 }
  0xf7   : > { %v482_v4 = vadd.f32 %v1187_v28, %v481_v3  ;;  %1368 = vmatprep.mubr.msk.f32.mxu1 %vm531_vm1, %v510_v0  ;;  %v513_v7 = vmax.f32 %v487_v2, 0.0 }
  0xf8   : > { %v1336_v5 = vpop.f32.mrf.mxu1  ;;  %1369 = vmatmul.mubr.msk.f32.gmra.mxu1 %vm531_vm1, %v511_v1 }
  0xf9   : > { %v512_v6 = vmax.f32 %v482_v4, 0.0  ;;  %v497_v8 = vadd.f32 %v1336_v5, %v1187_v28 }
  0xfa   : > { %v491_v9 = vpop.f32.mrf.mxu1 }
  0xfb   : > { %v492_v10 = vadd.f32 %v1187_v28, %v491_v9  ;;  %1371 = vmatprep.mubr.msk.f32.mxu1 %vm531_vm1, %v512_v6  ;;  %v515_v12 = vmax.f32 %v497_v8, 0.0 }
  0xfc   : > { %1372 = vmatmul.mubr.msk.f32.gmra.mxu1 %vm531_vm1, %v513_v7 }
  0xfd   : > { %v514_v11 = vmax.f32 %v492_v10, 0.0 }
  0xff   : > { %1374 = vmatprep.mubr.msk.f32.mxu1 %vm531_vm1, %v514_v11 }
 0x100   : > { %1375 = vmatmul.mubr.msk.f32.gmra.mxu1 %vm531_vm1, %v515_v12 }
 0x1a4   : > { %v1355_v16 = vpop.f32.mrf.mxu1 }
 0x1a5   : > { %v1721_v17 = vadd.f32 %v1355_v16, %v1718_v15  ;;  %v728_v16 = vld [vmem:[%s1939_s6 + $0x8] sm:$0xff] }
 0x1a6   : > { %v646_v18 = vpop.f32.mrf.mxu1 }
 0x1a7   : > { %v1724_v19 = vadd.f32 %v1718_v15, %v646_v18  ;;  %v730_v20 = vmul.f32 %v1721_v17, %v1721_v17  ;;  %v727_v18 = vld [vmem:[%s1939_s6] sm:$0xff] }
 0x1a8   : > { %v1358_v21 = vpop.f32.mrf.mxu1 }
 0x1a9   : > { %v1729_v22 = vadd.f32 %v1358_v21, %v1718_v15  ;;  %v748_v23 = vsel %vm306_vm0, %v730_v20, 0.0  ;;  %v729_v24 = vmul.f32 %v1724_v19, %v1724_v19  ;;  %v726_v20 = vld [vmem:[%s1938_s5 + $0x8] sm:$0xff]  ;;  %v948_v21 = vlaneseq }
 0x1aa   : > { %749 = vadd.xlane.f32.xlu0 %v748_v23  ;;  %v656_v25 = vpop.f32.mrf.mxu1 }
 0x1ab   : > { %v1735_v26 = vadd.f32 %v1718_v15, %v656_v25  ;;  %v732_v27 = vmul.f32 %v1729_v22, %v1729_v22  ;;  %v745_v31 = vsel %vm306_vm0, %v729_v24, 0.0 }
 0x1ac   : > { %v1361_v28 = vpop.f32.mrf.mxu1 }
 0x1ad   : > { %v1740_v29 = vadd.f32 %v1361_v28, %v1718_v15  ;;  %v754_v30 = vsel %vm306_vm0, %v732_v27, 0.0  ;;  %v731_v32 = vmul.f32 %v1735_v26, %v1735_v26 }
 0x1ae   : > { %755 = vadd.xlane.f32.xlu1 %v754_v30  ;;  %v666_v33 = vpop.f32.mrf.mxu1  ;;  %746 = vadd.xlane.f32.xlu0 %v745_v31 }
 0x1af   : > { %v1747_v34 = vadd.f32 %v1718_v15, %v666_v33  ;;  %v751_v37 = vsel %vm306_vm0, %v731_v32, 0.0  ;;  %v734_v39 = vmul.f32 %v1740_v29, %v1740_v29 }
 0x1b0   : > { %v1364_v35 = vpop.f32.mrf.mxu1 }
 0x1b1   : > { %v1750_v36 = vadd.f32 %v1364_v35, %v1718_v15  ;;  %v733_v38 = vmul.f32 %v1747_v34, %v1747_v34  ;;  %v760_v45 = vsel %vm306_vm0, %v734_v39, 0.0 }
 0x1b2   : > { %v676_v40 = vpop.f32.mrf.mxu1  ;;  %752 = vadd.xlane.f32.xlu1 %v751_v37 }
 0x1b3   : > { %v1758_v41 = vadd.f32 %v1718_v15, %v676_v40  ;;  %v757_v42 = vsel %vm306_vm0, %v733_v38, 0.0  ;;  %v736_v47 = vmul.f32 %v1750_v36, %v1750_v36 }
 0x1b4   : > { %v1367_v43 = vpop.f32.mrf.mxu1  ;;  %758 = vadd.xlane.f32.xlu0 %v757_v42 }
 0x1b5   : > { %v1762_v44 = vadd.f32 %v1367_v43, %v1718_v15  ;;  %v735_v46 = vmul.f32 %v1758_v41, %v1758_v41  ;;  %v766_v53 = vsel %vm306_vm0, %v736_v47, 0.0 }
 0x1b6   : > { %v686_v48 = vpop.f32.mrf.mxu1  ;;  %761 = vadd.xlane.f32.xlu1 %v760_v45 }
 0x1b7   : > { %v687_v49 = vadd.f32 %v1718_v15, %v686_v48  ;;  %v763_v50 = vsel %vm306_vm0, %v735_v46, 0.0  ;;  %v738_v55 = vmul.f32 %v1762_v44, %v1762_v44 }
 0x1b8   : > { %v1370_v51 = vpop.f32.mrf.mxu1  ;;  %764 = vadd.xlane.f32.xlu0 %v763_v50 }
 0x1b9   : > { %v702_v52 = vadd.f32 %v1370_v51, %v1718_v15  ;;  %v737_v54 = vmul.f32 %v687_v49, %v687_v49  ;;  %v772_v61 = vsel %vm306_vm0, %v738_v55, 0.0 }
 0x1ba   : > { %v696_v56 = vpop.f32.mrf.mxu1  ;;  %767 = vadd.xlane.f32.xlu1 %v766_v53 }
 0x1bb   : > { %v697_v57 = vadd.f32 %v1718_v15, %v696_v56  ;;  %v769_v58 = vsel %vm306_vm0, %v737_v54, 0.0  ;;  %v740_v63 = vmul.f32 %v702_v52, %v702_v52 }
 0x1bc   : > { %v1373_v59 = vpop.f32.mrf.mxu1  ;;  %770 = vadd.xlane.f32.xlu0 %v769_v58 }
 0x1bd   : > { %v712_v60 = vadd.f32 %v1373_v59, %v1718_v15  ;;  %v739_v62 = vmul.f32 %v697_v57, %v697_v57  ;;  %v778_v5 = vsel %vm306_vm0, %v740_v63, 0.0 }
 0x1be   : > { %v706_v0 = vpop.f32.mrf.mxu1  ;;  %773 = vadd.xlane.f32.xlu1 %v772_v61 }
 0x1bf   : > { %v707_v1 = vadd.f32 %v1718_v15, %v706_v0  ;;  %v775_v2 = vsel %vm306_vm0, %v739_v62, 0.0  ;;  %v742_v7 = vmul.f32 %v712_v60, %v712_v60 }
 0x1c0   : > { %v1376_v3 = vpop.f32.mrf.mxu1  ;;  %776 = vadd.xlane.f32.xlu0 %v775_v2 }
 0x1c1   : > { %v722_v4 = vadd.f32 %v1376_v3, %v1718_v15  ;;  %v741_v6 = vmul.f32 %v707_v1, %v707_v1  ;;  %v784_v11 = vsel %vm306_vm0, %v742_v7, 0.0 }
 0x1c2   : > { %v716_v8 = vpop.f32.mrf.mxu1  ;;  %779 = vadd.xlane.f32.xlu1 %v778_v5 }
 0x1c3   : > { %v717_v9 = vadd.f32 %v1718_v15, %v716_v8  ;;  %1377 = vmatprep.subr.msk.mxu0 %vm306_vm0, %v722_v4  ;;  %v781_v10 = vsel %vm306_vm0, %v741_v6, 0.0  ;;  %v744_v13 = vmul.f32 %v722_v4, %v722_v4 }
 0x1c4   : > { %1378 = vmatpush3.xpose.msk.msra.mxu0 %vm306_vm0, %v722_v4  ;;  %782 = vadd.xlane.f32.xlu0 %v781_v10 }
 0x1c5   : > { %1379 = vmatprep.subr.msk.mxu0 %vm306_vm0, %v717_v9  ;;  %v743_v12 = vmul.f32 %v717_v9, %v717_v9  ;;  %v790_v15 = vsel %vm306_vm0, %v744_v13, 0.0 }
 0x1c6   : > { %785 = vadd.xlane.f32.xlu1 %v784_v11 }
 0x1c7   : > { %v787_v14 = vsel %vm306_vm0, %v743_v12, 0.0 }
 0x1c8   : > { %1380 = vmatpush3.xpose.msk.msra.mxu0 %vm306_vm0, %v717_v9  ;;  %788 = vadd.xlane.f32.xlu0 %v787_v14 }
 0x1c9   : > { %1381 = vmatprep.subr.msk.mxu0 %vm306_vm0, %v712_v60 }
 0x1ca   : > { %791 = vadd.xlane.f32.xlu1 %v790_v15 }
 0x1cc   : > { %1382 = vmatpush3.xpose.msk.msra.mxu0 %vm306_vm0, %v712_v60 }
 0x1cd   : > { %1383 = vmatprep.subr.msk.mxu0 %vm306_vm0, %v707_v1 }
 0x1d0   : > { %1384 = vmatpush3.xpose.msk.msra.mxu0 %vm306_vm0, %v707_v1 }
 0x1d1   : > { %1385 = vmatprep.subr.msk.mxu0 %vm306_vm0, %v702_v52 }
 0x1d4   : > { %1386 = vmatpush3.xpose.msk.msra.mxu0 %vm306_vm0, %v702_v52 }
 0x1d5   : > { %1387 = vmatprep.subr.msk.mxu0 %vm306_vm0, %v697_v57 }
 0x1d8   : > { %1388 = vmatpush3.xpose.msk.msra.mxu0 %vm306_vm0, %v697_v57 }
 0x1d9   : > { %1389 = vmatprep.subr.msk.mxu0 %vm306_vm0, %v1762_v44 }
 0x1db   : > { %929 = vperm.xlu1 %1456, %v728_v16  }
 0x1dc   : > { %1390 = vmatpush3.xpose.msk.msra.mxu0 %vm306_vm0, %v1762_v44 }
 0x1dd   : > { %1391 = vmatprep.subr.msk.mxu0 %vm306_vm0, %v687_v49 }
 0x1de   : > { %924 = vperm.xlu0 %1455, %v727_v18  }
 0x1e0   : > { %1392 = vmatpush3.xpose.msk.msra.mxu0 %vm306_vm0, %v687_v49 }
 0x1e1   : > { %1393 = vmatprep.subr.msk.mxu0 %vm306_vm0, %v1750_v36 }
 0x1e4   : > { %1394 = vmatpush3.xpose.msk.msra.mxu0 %vm306_vm0, %v1750_v36 }
 0x1e5   : > { %1395 = vmatprep.subr.msk.mxu0 %vm306_vm0, %v1758_v41 }
 0x1e8   : > { %1396 = vmatpush3.xpose.msk.msra.mxu0 %vm306_vm0, %v1758_v41 }
 0x1e9   : > { %1397 = vmatprep.subr.msk.mxu0 %vm306_vm0, %v1740_v29 }
 0x1ec   : > { %1398 = vmatpush3.xpose.msk.msra.mxu0 %vm306_vm0, %v1740_v29 }
 0x1ed   : > { %1399 = vmatprep.subr.msk.mxu0 %vm306_vm0, %v1747_v34 }
 0x1f0   : > { %1400 = vmatpush3.xpose.msk.msra.mxu0 %vm306_vm0, %v1747_v34 }
 0x1f1   : > { %1401 = vmatprep.subr.msk.mxu0 %vm306_vm0, %v1729_v22 }
 0x1f4   : > { %1402 = vmatpush3.xpose.msk.msra.mxu0 %vm306_vm0, %v1729_v22  ;;  %v1848_v22 = vand.u32 127, %v948_v21 }
 0x1f5   : > { %1403 = vmatprep.subr.msk.mxu0 %vm306_vm0, %v1735_v26 }
 0x1f6   : > { %v961_v25 = vadd.s32 4294967280, %v1848_v22  ;;  %v968_v30 = vadd.s32 4294967272, %v1848_v22  ;;  %v975_v32 = vadd.s32 4294967264, %v1848_v22  ;;  %v982_v37 = vadd.s32 4294967256, %v1848_v22 }
 0x1f7   : > { %v989_v42 = vadd.s32 4294967248, %v1848_v22  ;;  %v996_v48 = vadd.s32 4294967240, %v1848_v22  ;;  %v1003_v53 = vadd.s32 4294967232, %v1848_v22  ;;  %v1010_v58 = vadd.s32 4294967224, %v1848_v22 }
 0x1f8   : > { %1404 = vmatpush3.xpose.msk.msra.mxu0 %vm306_vm0, %v1735_v26  ;;  %v954_v26 = vadd.s32 4294967288, %v1848_v22  ;;  %v1017_v63 = vadd.s32 4294967216, %v1848_v22  ;;  %v1024_v4 = vadd.s32 4294967208, %v1848_v22  ;;  %v1031_v9 = vadd.s32 4294967200, %v1848_v22 }
 0x1f9   : > { %1405 = vmatprep.subr.msk.mxu0 %vm306_vm0, %v1721_v17  ;;  %v1038_v14 = vadd.s32 4294967192, %v1848_v22 }
 0x1fc   : > { %1406 = vmatpush3.xpose.msk.msra.mxu0 %vm306_vm0, %v1721_v17  ;;  %v1851_v17 = vshrl.u32 %v948_v21, 7  ;;  %v1045_v21 = vadd.s32 4294967184, %v1848_v22 }
 0x1fd   : > { %1407 = vmatprep.subr.msk.mxu0 %vm306_vm0, %v1724_v19 }
 0x1fe   : > { %v964_v28 = vsub.s32 %v961_v25, %v1851_v17  ;;  %v957_v29 = vsub.s32 %v954_v26, %v1851_v17  ;;  %v971_v36 = vsub.s32 %v968_v30, %v1851_v17  ;;  %v978_v38 = vsub.s32 %v975_v32, %v1851_v17 }
 0x1ff   : > { %v985_v44 = vsub.s32 %v982_v37, %v1851_v17  ;;  %v992_v49 = vsub.s32 %v989_v42, %v1851_v17  ;;  %v999_v54 = vsub.s32 %v996_v48, %v1851_v17  ;;  %v1006_v59 = vsub.s32 %v1003_v53, %v1851_v17 }
 0x200   : > { %1408 = vmatpush3.xpose.msk.msra.mxu0 %vm306_vm0, %v1724_v19  ;;  %v952_v19 = vsub.s32 %v1848_v22, %v1851_v17  ;;  %v1013_v0 = vsub.s32 %v1010_v58, %v1851_v17  ;;  %v1020_v5 = vsub.s32 %v1017_v63, %v1851_v17  ;;  %v1027_v10 = vsub.s32 %v1024_v4, %v1851_v17 }
 0x201   : > { %v1034_v15 = vsub.s32 %v1031_v9, %v1851_v17 }
 0x203   : > { %1410 = vmatmul.mubr.msk.f32.vlgmr.msra.gmra.mxu0 %vm306_vm0, %v726_v20  ;;  %vm1057_vm0 = vcmask 1048512  }
 0x233   : > { %v750_v23 = vpop.xlane.xlu0 %749 }
 0x234   : > { %v958_v35 = vrot.slane %v750_v23, %v957_v29  ;;  %v1041_v23 = vsub.s32 %v1038_v14, %v1851_v17 }
 0x237   : > { %v756_v24 = vpop.xlane.xlu1 %755  ;;  %v747_v27 = vpop.xlane.xlu0 %746 }
 0x238   : > { %v953_v33 = vrot.slane %v747_v27, %v952_v19  ;;  %v972_v43 = vrot.slane %v756_v24, %v971_v36  ;;  %v1052_v19 = vadd.s32 4294967176, %v1848_v22  ;;  %v1048_v27 = vsub.s32 %v1045_v21, %v1851_v17 }
 0x23a   : > { %v960_v39 = vsel %vm959_vm2, %v958_v35, %v953_v33 }
 0x23b   : > { %v753_v31 = vpop.xlane.xlu1 %752 }
 0x23c   : > { %v965_v34 = vrot.slane %v753_v31, %v964_v28  ;;  %v1055_v31 = vsub.s32 %v1052_v19, %v1851_v17 }
 0x23d   : > { %v759_v40 = vpop.xlane.xlu0 %758 }
 0x23e   : > { %v967_v41 = vsel %vm966_vm3, %v965_v34, %v960_v39  ;;  %v979_v45 = vrot.slane %v759_v40, %v978_v38 }
 0x23f   : > { %v762_v46 = vpop.xlane.xlu1 %761  ;;  %v974_v47 = vsel %vm973_vm4, %v972_v43, %v967_v41 }
 0x240   : > { %v986_v50 = vrot.slane %v762_v46, %v985_v44  ;;  %v981_v52 = vsel %vm980_vm5, %v979_v45, %v974_v47 }
 0x241   : > { %v765_v51 = vpop.xlane.xlu0 %764 }
 0x242   : > { %v993_v55 = vrot.slane %v765_v51, %v992_v49  ;;  %v988_v57 = vsel %vm987_vm6, %v986_v50, %v981_v52 }
 0x243   : > { %v768_v56 = vpop.xlane.xlu1 %767 }
 0x244   : > { %v1000_v60 = vrot.slane %v768_v56, %v999_v54  ;;  %v995_v62 = vsel %vm994_vm7, %v993_v55, %v988_v57 }
 0x245   : > { %v771_v61 = vpop.xlane.xlu0 %770 }
 0x246   : > { %v1007_v1 = vrot.slane %v771_v61, %v1006_v59  ;;  %v1002_v3 = vsel %vm1001_vm8, %v1000_v60, %v995_v62 }
 0x247   : > { %v774_v2 = vpop.xlane.xlu1 %773 }
 0x248   : > { %v1014_v6 = vrot.slane %v774_v2, %v1013_v0  ;;  %v1009_v8 = vsel %vm1008_vm9, %v1007_v1, %v1002_v3 }
 0x249   : > { %v777_v7 = vpop.xlane.xlu0 %776 }
 0x24a   : > { %v1021_v11 = vrot.slane %v777_v7, %v1020_v5  ;;  %v1016_v13 = vsel %vm1015_vm10, %v1014_v6, %v1009_v8 }
 0x24b   : > { %v780_v12 = vpop.xlane.xlu1 %779 }
 0x24c   : > { %v1028_v16 = vrot.slane %v780_v12, %v1027_v10  ;;  %v1023_v20 = vsel %vm1022_vm11, %v1021_v11, %v1016_v13 }
 0x24d   : > { %v783_v18 = vpop.xlane.xlu0 %782 }
 0x24e   : > { %v1035_v24 = vrot.slane %v783_v18, %v1034_v15  ;;  %v1030_v26 = vsel %vm1029_vm12, %v1028_v16, %v1023_v20 }
 0x24f   : > { %v786_v25 = vpop.xlane.xlu1 %785 }
 0x250   : > { %v1042_v28 = vrot.slane %v786_v25, %v1041_v23  ;;  %v1037_v30 = vsel %vm1036_vm13, %v1035_v24, %v1030_v26 }
 0x251   : > { %v789_v29 = vpop.xlane.xlu0 %788 }
 0x252   : > { %v1049_v32 = vrot.slane %v789_v29, %v1048_v27  ;;  %v1044_v34 = vsel %vm1043_vm14, %v1042_v28, %v1037_v30 }
 0x253   : > { %v792_v33 = vpop.xlane.xlu1 %791 }
 0x254   : > { %v1056_v35 = vrot.slane %v792_v33, %v1055_v31  ;;  %v1051_v36 = vsel %vm1050_vm15, %v1049_v32, %v1044_v34 }
 0x256   : > { %v1058_v38 = vsel %vm1057_vm0, %v1056_v35, %v1051_v36 }
 0x257   : > { %v930_v37 = vpop.permute.xlu1 %929 }
 0x258   : > { %v1073_v22 = vadd.f32 %v1058_v38, %v930_v37 }
 0x259   : > { %v925_v39 = vpop.permute.xlu0 %924 }
 0x25a   : > { %v1072_v43 = vadd.f32 %v1058_v38, %v925_v39 }
 0x2c3   : > { %v1411_v40 = vpop.f32.mrf.mxu0 }
 0x2c4   : > { %v1075_v41 = vmul.f32 2.0, %v1411_v40 }
 0x2c5   : > { %v913_v42 = vpop.f32.mrf.mxu0 }
 0x2c6   : > { %v1077_v44 = vsub.f32 %v1073_v22, %v1075_v41  ;;  %v1074_v45 = vmul.f32 2.0, %v913_v42 }
 0x2c8   : > { %v1079_v46 = vmax.f32 %v1077_v44, 0.0  ;;  %v1076_v47 = vsub.f32 %v1072_v43, %v1074_v45 }
 0x2ca   : > { %v1081_v17 = vadd.f32 1.0, %v1079_v46  ;;  %v1078_v48 = vmax.f32 %v1076_v47, 0.0 }
 0x2cc   : > { %1457 = vrcp.f32 %v1081_v17  ;;  %v1080_v49 = vadd.f32 1.0, %v1078_v48 }
 0x2ce   : > { %1459 = vrcp.f32 %v1080_v49 }
 0x2d9   : > { %v1458_v50 = vpop.eup %1457 }
 0x2da   : > { %v1085_v51 = vmul.f32 %v1458_v50, %v1081_v17 }
 0x2db   : > { %v1460_v52 = vpop.eup %1459 }
 0x2dc   : > { %v1087_v53 = vsub.f32 2.0, %v1085_v51  ;;  %v1084_v54 = vmul.f32 %v1460_v52, %v1080_v49 }
 0x2de   : > { %v1086_v55 = vsub.f32 2.0, %v1084_v54  ;;  %v1089_v56 = vmul.f32 %v1458_v50, %v1087_v53 }
 0x2e0   : > { %v1088_v57 = vmul.f32 %v1460_v52, %v1086_v55 }
 0x2e2   : > { %v1090_v58 = vadd.f32 %v1089_v56, %v1088_v57 }
 0x2e4   : > { %v1091_v59 = vrot.slane %v1090_v58, 4 }
 0x2e6   : > { %v1092_v60 = vadd.f32 %v1091_v59, %v1090_v58 }
 0x2e8   : > { %v1093_v61 = vrot.slane %v1092_v60, 2 }
 0x2ea   : > { %v1094_v62 = vadd.f32 %v1093_v61, %v1092_v60 }
 0x2ec   : > { %v1095_v63 = vrot.slane %v1094_v62, 1 }
 0x2ee   : > { %v1096_v0 = vadd.f32 %v1095_v63, %v1094_v62 }
 0x2f0   : > { %1461 = vrcp.f32 %v1096_v0 }
 0x2fd   : > { %v1462_v1 = vpop.eup %1461 }
 0x2fe   : > { %v1098_v2 = vmul.f32 %v1462_v1, %v1096_v0 }
 0x300   : > { %v1099_v3 = vsub.f32 2.0, %v1098_v2 }
 0x302   : > { %v1100_v4 = vmul.f32 %v1462_v1, %v1099_v3 }
 0x304   : > { %v1101_v5 = vmul.f32 %v1100_v4, %v1088_v57  ;;  %v1102_v6 = vmul.f32 %v1100_v4, %v1089_v56 }
 0x306   : > { %1103 = vst [vmem:[%s272_s16] sm:$0xff] %v1101_v5  ;;  %1104 = vst [vmem:[%s272_s16 + $0x8] sm:$0xff] %v1102_v6 }
 0x307   : > { %1476 = shalt.err (!%p1473_p3)
}
 0x308   : > { %s1477_s29 = scalar_lea.hbm %s1889_s19, 256  ;;  %s1481_s14 = scalar_lea.hbm %s1940_s7, 512 }
 0x309   : > { %p1478_p4 = scmp.ne.s32.totalorder %s1889_s19, %s1477_s29  ;;  %p1482_p9 = scmp.lt.s32.totalorder %s1889_s19, %s1940_s7 }
 0x30a   : > { %p1483_p10 = scmp.lt.s32.totalorder %s1481_s14, %s1477_s29 }
 0x30b   : > { %p1479_p7 = pnand %p1478_p4, %p1608_p5 }
 0x30c   : > { %p1484_p11 = por %p1483_p10, %p1482_p9 }
 0x30d   : > { %p1480_p8 = pneg %p1479_p7 }
 0x30f   : > { %p1485_p12 = pnand %p1484_p11, %p1480_p8 }
 0x311   : > { %1488 = shalt.err (!%p1485_p12)
}
 0x312   : > { %s1527_s17 = smov 128   ;;  %s1528_s18 = smov 256  }
 0x313   : > { %s1529_s28 = smov 8  }
 0x314   : > { %1412 = dma.vmem_to_hbm [thread:$0]  (%p1608_p5), %s1891_s8, 256, %s1889_s19, %s1893_s20, %s1527_s17, %s1528_s18, %s1529_s28  }
 0x315 PF: > { %p1418_p13 = scmp.ge.s32.totalorder %s1523_s27, 2  ;;  %s1133_s21 = sand.u32 1, %s1511_s24  }
 0x316   : > { %s1134_s22 = scalar_lea.sflag [#allocation3], %s1133_s21 }
 0x317   : > { %p1415_p0 = pnand %p1418_p13, %p1612_p6 }
 0x319   : > { %p1416_p1 = pneg %p1415_p0 }
 0x31b   : > { %1506 = dma.done.wait (%p1416_p1), %s1134_s22, 256  }
 0x31c   : > { %1508 = vsyncadd (%p1416_p1), %s1134_s22, 4294967040  ;;  %p17_p2 = scmp.ge.s32.totalorder %s1595_s30, 4   ;;  %s1943_s24 = smov %s1515_s25 }
 0x31d   : > { %s1944_s25 = smov %s1519_s26  ;;  %s1945_s26 = smov %s1606_s10 }
 0x31e   : > { %s1946_s27 = smov %s1595_s30  ;;  %19 = sbr.rel (!%p17_p2) target bundleno = 3 (0x3), region = 83 }
 0x323   :  { %1139 = vsyncpa [#allocation3], 1 }
 0x324   :  { %1141 = vsyncpa [#allocation3 + $0x1], 1 }

</bundles_post_ra>
